<compile_context>
chip_gen: v5e
topology: v5e:2x2
jax: 0.10.0
libtpu: 0.0.40
codegen_flags: <defaults>
</compile_context>

<pallas_src>
import numpy as np
import jax
import jax.numpy as jnp
from jax.experimental import pallas as pl
from jax.experimental.pallas import tpu as pltpu


# ----------------------------------------------------------------------------
# no_routing path (PrimaryCapsules): im2col glue + batch-folded MXU matmul + squash
# ----------------------------------------------------------------------------
def capsule_no_routing_forward(x, conv_w, conv_b, stride=2):
    """x: (B, C, H, W); conv_w: (NU, 32, C, 9, 9); conv_b: (NU, 32).
    Returns (B, NU, 32*Ho*Wo), squashed over the last dim (torch dim=2)."""
    B, C, H, W = x.shape
    NU, OC, _, KH, KW = conv_w.shape
    Ho = (H - KH) // stride + 1
    Wo = (W - KW) // stride + 1
    HWo = Ho * Wo
    K = C * KH * KW
    NUOC = NU * OC
    Kp = ((K + 127) // 128) * 128

    # im2col (plain-JAX glue). Feature order = (c, kh, kw), matching the torch
    # (OC, C, KH, KW) weight flattening.
    # TODO(synk): for production sizes (C=256, 20x20 inputs) form the patch rows
    #             in-kernel from a VMEM-resident (C,H,W) tile instead of the ~20x
    #             im2col HBM blow-up.
    cols = []
    for dh in range(KH):
        for dw in range(KW):
            cols.append(x[:, :, dh:dh + stride * Ho:stride, dw:dw + stride * Wo:stride])
    p = jnp.stack(cols, axis=2).reshape(B, K, HWo)               # (B, K, Ho*Wo)
    p = jnp.transpose(p, (0, 2, 1)).reshape(B * HWo, K)          # rows = (batch, pixel)
    p = jnp.pad(p, ((0, 0), (0, Kp - K))).astype(jnp.bfloat16)

    # Weights as (Kp, NU*OC): MXU N / lane dim = NU*OC (lane-dense output).
    wmat = jnp.pad(conv_w.reshape(NUOC, K).T, ((0, Kp - K), (0, 0))).astype(jnp.bfloat16)
    bias = conv_b.reshape(1, NUOC).astype(jnp.float32)

    # GM[m', m] = 1 iff columns m', m belong to the same capsule unit.
    col_u = jnp.arange(NUOC) // OC
    GM = (col_u[:, None] == col_u[None, :]).astype(jnp.float32)  # (NUOC, NUOC)

    # Fold batch into MXU M: tile M in whole batches, target >= 256 rows when possible.
    Bt = B
    for d in range(1, B + 1):
        if B % d == 0 and d * HWo >= 256 and (d * HWo) % 8 == 0:
            Bt = d
            break
    MT = Bt * HWo

    # K grid axis ("arbitrary") with an f32 VMEM accumulator.
    tk = min(Kp, 2048)
    while Kp % tk:
        tk -= 128
    nK = Kp // tk

    def conv_kernel(p_ref, w_ref, b_ref, gm_ref, o_ref, acc_ref):
        k = pl.program_id(1)

        @pl.when(k == 0)
        def _():
            acc_ref[...] = jnp.zeros_like(acc_ref)

        acc_ref[...] += jnp.dot(p_ref[...], w_ref[...],
                                preferred_element_type=jnp.float32)

        @pl.when(k == pl.num_programs(1) - 1)
        def _():
            conv = acc_ref[...] + b_ref[...]                       # (Bt*HWo, NUOC) f32
            for b in range(Bt):                                    # tiny epilogue unroll
                cb = conv[b * HWo:(b + 1) * HWo, :]
                # reduce over pixels first, then the tiny (1,NUOC)x(NUOC,NUOC) GM dot
                col_sq = jnp.sum(cb * cb, axis=0, keepdims=True)   # (1, NUOC)
                unit_sq = jnp.dot(col_sq, gm_ref[...],
                                  preferred_element_type=jnp.float32)
                scale = (unit_sq / (1.0 + unit_sq)) * jax.lax.rsqrt(unit_sq)
                o_ref[b] = cb * scale

    out = pl.pallas_call(
        conv_kernel,
        out_shape=jax.ShapeDtypeStruct((B, HWo, NUOC), jnp.float32),
        grid=(B // Bt, nK),
        in_specs=[
            pl.BlockSpec((MT, tk), lambda bt, k: (bt, k)),
            pl.BlockSpec((tk, NUOC), lambda bt, k: (k, 0)),
            pl.BlockSpec((1, NUOC), lambda bt, k: (0, 0)),
            pl.BlockSpec((NUOC, NUOC), lambda bt, k: (0, 0)),
        ],
        out_specs=pl.BlockSpec((Bt, HWo, NUOC), lambda bt, k: (bt, 0, 0)),
        scratch_shapes=[pltpu.VMEM((MT, NUOC), jnp.float32)],
        compiler_params=pltpu.CompilerParams(
            dimension_semantics=("parallel", "arbitrary")),
    )(p, wmat, bias, GM)

    # (B, HWo, NU*OC) -> (B, NU, OC*HWo): matches torch .view(B, NU, -1) ordering.
    return out.reshape(B, HWo, NU, OC).transpose(0, 2, 3, 1).reshape(B, NU, OC * HWo)


# ----------------------------------------------------------------------------
# routing path (DigitCaps): parallel bf16 u_hat build + batch-fused routing loop
# ----------------------------------------------------------------------------
def capsule_routing_forward(x, weight, num_routing):
    """x: (B, in_unit, in_channel); weight: (in_channel, num_unit, unit_size, in_unit)
    (the torch param's leading 1 squeezed away). Returns (B, num_unit, unit_size, 1)."""
    B, IU, IC = x.shape
    IC_w, NU, US, IU_w = weight.shape
    assert IC_w == IC and IU_w == IU
    NUUS = NU * US
    BN = B * NUUS

    # Lane-dense layouts:
    #   xt (B, IC, IU)      -- x.transpose(1,2)
    #   w  (IU, IC, NU*US)  -- w[l, i, n*US+k] = weight[i, n, k, l]
    xt = jnp.transpose(x, (0, 2, 1)).astype(jnp.float32)
    w = jnp.transpose(weight, (3, 0, 1, 2)).reshape(IU, IC, NUUS).astype(jnp.float32)

    # ---- kernel A: u_hat build, megacore-parallel over (batch, IC chunks), bf16 out
    ICB = 256 if IC % 256 == 0 else IC
    nIC = IC // ICB
    CH = 64 if ICB % 64 == 0 else ICB

    def uhat_kernel(x_ref, w_ref, u_ref):
        # u_hat[b, i, m] = sum_l w[l, i, m] * x[b, i, l]; broadcast-FMA chain on the
        # VPU, f32 accumulation, bf16 store. 64-row chunks keep acc + w slice in vregs.
        for c0 in range(0, ICB, CH):
            xc = x_ref[0, c0:c0 + CH, :]                   # (CH, IU), read once per chunk
            acc = w_ref[0, c0:c0 + CH, :] * xc[:, 0:1]
            for l in range(1, IU):
                acc = acc + w_ref[l, c0:c0 + CH, :] * xc[:, l:l + 1]
            u_ref[0, c0:c0 + CH, :] = acc.astype(u_ref.dtype)

    uhat = pl.pallas_call(
        uhat_kernel,
        out_shape=jax.ShapeDtypeStruct((B, IC, NUUS), jnp.bfloat16),
        grid=(B, nIC),
        in_specs=[
            pl.BlockSpec((1, ICB, IU), lambda b, c: (b, c, 0)),
            pl.BlockSpec((IU, ICB, NUUS), lambda b, c: (0, c, 0)),
        ],
        out_specs=pl.BlockSpec((1, ICB, NUUS), lambda b, c: (b, c, 0)),
        compiler_params=pltpu.CompilerParams(
            dimension_semantics=("parallel", "parallel")),
    )(xt, w)

    # Fused lane-dense layouts for the routing iterations (one-time cheap relayout):
    #   u2 (IC, B*NUUS): t = c @ u2 is a single bf16 MXU matmul over all batches
    #   ut (B*NUUS, IC): the agreement update becomes an NN matmul (no per-iter transpose)
    u2 = jnp.transpose(uhat, (1, 0, 2)).reshape(IC, BN)
    ut = jnp.transpose(uhat, (0, 2, 1)).reshape(BN, IC)

    m_idx = jnp.arange(NUUS)
    E = (m_idx[None, :] // US == jnp.arange(NU)[:, None]).astype(jnp.float32)   # (NU, NUUS)
    Ebig = jnp.tile(E, (1, B))                                                  # (NU, BN)
    M = ((m_idx[:, None] % US) == (m_idx[None, :] % US)).astype(jnp.float32)    # (NUUS, NUUS)
    Mbig = jnp.kron(jnp.eye(B, dtype=jnp.float32), M)                           # (BN, BN)
    # TODO(synk): for large B / production IC, stream u_hat tiles per iteration with
    #             manual DMA and a per-batch squash instead of the (BN, BN) mask so
    #             the routing kernel's VMEM stays batch-independent.

    inv_b = 1.0 / B

    def routing_kernel(u2_ref, ut_ref, e_ref, m_ref, v_ref):
        u2v = u2_ref[...]          # (IC, BN) bf16
        utv = ut_ref[...]          # (BN, IC) bf16
        e = e_ref[...]             # (NU, BN) f32
        mm = m_ref[...]            # (BN, BN) f32

        def body(_, carry):
            b_ij, _v = carry
            # legacy F.softmax on a 4D tensor (no dim) => softmax over in_channel (lanes)
            bmax = jnp.max(b_ij, axis=1, keepdims=True)
            ex = jnp.exp(b_ij - bmax)
            c = ex / jnp.sum(ex, axis=1, keepdims=True)                          # (NU, IC)
            # one bf16 MXU matmul over all batches:
            #   t[n, b*NUUS+m] = sum_i c[n,i] * u_hat[b,i,m]
            t = jnp.dot(c.astype(jnp.bfloat16), u2v,
                        preferred_element_type=jnp.float32)                      # (NU, BN)
            s = jnp.sum(t * e, axis=0, keepdims=True)                            # (1, BN)
            # squash over the num_unit axis (repo utils.squash dim=2 quirk), per batch
            mag_sq = jnp.dot(s * s, mm, preferred_element_type=jnp.float32)      # (1, BN)
            v = s * (mag_sq / (1.0 + mag_sq)) * jax.lax.rsqrt(mag_sq)            # (1, BN)
            # agreement: one NN bf16 matmul with K = B*NUUS
            agree = jnp.dot((e * v).astype(jnp.bfloat16), utv,
                            preferred_element_type=jnp.float32)                  # (NU, IC)
            return b_ij + agree * inv_b, v

        init = (jnp.zeros((NU, IC), jnp.float32), jnp.zeros((1, BN), jnp.float32))
        _, v = jax.lax.fori_loop(0, num_routing, body, init)
        v_ref[...] = v

    v = pl.pallas_call(
        routing_kernel,
        out_shape=jax.ShapeDtypeStruct((1, BN), jnp.float32),
        grid=(1,),
        in_specs=[
            pl.BlockSpec((IC, BN), lambda i: (0, 0)),
            pl.BlockSpec((BN, IC), lambda i: (0, 0)),
            pl.BlockSpec((NU, BN), lambda i: (0, 0)),
            pl.BlockSpec((BN, BN), lambda i: (0, 0)),
        ],
        out_specs=pl.BlockSpec((1, BN), lambda i: (0, 0)),
        compiler_params=pltpu.CompilerParams(dimension_semantics=("arbitrary",)),
    )(u2, ut, Ebig, Mbig)

    # (1, B*NUUS) -> (B, NU, US, 1) == v_j.squeeze(1)
    return v.reshape(B, NU, US)[..., None]


# ----------------------------------------------------------------------------
# plain-JAX references (mirror the PyTorch math) for validation
# ----------------------------------------------------------------------------
def ref_no_routing(x, conv_w, conv_b, stride=2):
    B = x.shape[0]
    NU = conv_w.shape[0]
    outs = []
    for u in range(NU):
        o = jax.lax.conv_general_dilated(
            x, conv_w[u], window_strides=(stride, stride), padding="VALID",
            dimension_numbers=("NCHW", "OIHW", "NCHW"))
        o = o + conv_b[u][None, :, None, None]
        outs.append(o)
    unit = jnp.stack(outs, axis=1).reshape(B, NU, -1)
    mag_sq = jnp.sum(unit * unit, axis=2, keepdims=True)
    mag = jnp.sqrt(mag_sq)
    return (mag_sq / (1.0 + mag_sq)) * (unit / mag)


def ref_routing(x, weight, num_routing):
    B = x.shape[0]
    xt = jnp.transpose(x, (0, 2, 1))                                  # (B, IC, IU)
    u_hat = jnp.einsum("inkl,bil->bink", weight, xt)                  # (B, IC, NU, US)
    IC, NU = weight.shape[0], weight.shape[1]
    b_ij = jnp.zeros((IC, NU), jnp.float32)
    v = None
    for _ in range(num_routing):
        c = jax.nn.softmax(b_ij, axis=0)
        s = jnp.einsum("in,bink->bnk", c, u_hat)
        mag_sq = jnp.sum(s * s, axis=1, keepdims=True)
        mag = jnp.sqrt(mag_sq)
        v = (mag_sq / (1.0 + mag_sq)) * (s / mag)
        b_ij = b_ij + jnp.einsum("bink,bnk->in", u_hat, v) / B
    return v[..., None]


if __name__ == "__main__":
    key = jax.random.PRNGKey(0)
    k1, k2, k3, k4 = jax.random.split(key, 4)

    # PrimaryCaps(in_channel=4, num_unit=8) on a 2x4x16x16 input, then
    # DigitCaps(in_unit=8, in_channel=512, num_unit=10, unit_size=16, routing=3).
    B, C, H, W = 2, 4, 16, 16
    NU_PRIM, OC, KH = 8, 32, 9
    x = jax.random.normal(k1, (B, C, H, W), dtype=jnp.float32)
    conv_w = 0.05 * jax.random.normal(k2, (NU_PRIM, OC, C, KH, KH), dtype=jnp.float32)
    conv_b = 0.05 * jax.random.normal(k3, (NU_PRIM, OC), dtype=jnp.float32)

    Ho = (H - KH) // 2 + 1
    IC_DIGIT = OC * Ho * Ho          # 32 * 4 * 4 = 512
    NU_DIGIT, US, IU, NUM_ROUTING = 10, 16, NU_PRIM, 3
    # torch.randn(1, in_channel, num_unit, unit_size, in_unit) with the leading 1 squeezed
    digit_w = jax.random.normal(k4, (IC_DIGIT, NU_DIGIT, US, IU), dtype=jnp.float32)

    # --- no_routing (PrimaryCapsules) ---
    prim = jax.block_until_ready(capsule_no_routing_forward(x, conv_w, conv_b))
    prim_ref = jax.block_until_ready(ref_no_routing(x, conv_w, conv_b))
    np.testing.assert_allclose(np.asarray(prim), np.asarray(prim_ref), rtol=2e-2, atol=2e-3)

    # --- routing (DigitCaps), fed with the PrimaryCapsules output ---
    digits = jax.block_until_ready(capsule_routing_forward(prim, digit_w, NUM_ROUTING))
    digits_ref = jax.block_until_ready(ref_routing(prim_ref, digit_w, NUM_ROUTING))
    np.testing.assert_allclose(np.asarray(digits), np.asarray(digits_ref), rtol=5e-2, atol=5e-5)

    assert prim.shape == (B, NU_PRIM, OC * Ho * Ho)
    assert digits.shape == (B, NU_DIGIT, US, 1)
    print("KERNEL_OK")
</pallas_src>

<mosaic_0001>
module attributes {stable_mosaic.version = 11 : i64} {
  func.func @conv_kernel(%arg0: i32, %arg1: i32, %arg2: memref<32x384xbf16, #tpu.memory_space<vmem>>, %arg3: memref<384x256xbf16, #tpu.memory_space<vmem>>, %arg4: memref<1x256xf32, #tpu.memory_space<vmem>>, %arg5: memref<256x256xf32, #tpu.memory_space<vmem>>, %arg6: memref<2x16x256xf32, #tpu.memory_space<vmem>>, %arg7: memref<32x256xf32, #tpu.memory_space<vmem>>) attributes {dimension_semantics = [#tpu.dimension_semantics<parallel>, #tpu.dimension_semantics<arbitrary>], iteration_bounds = array<i64: 1, 1>, scalar_prefetch = 0 : i64, scratch_operands = 1 : i64, tpu.core_type = #tpu.core_type<tc>, window_params = [{transform_indices = @transform_0, window_bounds = array<i64: 32, 384>}, {transform_indices = @transform_1, window_bounds = array<i64: 384, 256>}, {pipeline_mode = #tpu.pipeline_mode<synchronous>, transform_indices = @transform_2, window_bounds = array<i64: 1, 256>}, {pipeline_mode = #tpu.pipeline_mode<synchronous>, transform_indices = @transform_3, window_bounds = array<i64: 256, 256>}, {transform_indices = @transform_4, window_bounds = array<i64: 2, 16, 256>}]} {
    %c0_i32 = arith.constant 0 : i32
    %0 = arith.cmpi eq, %arg1, %c0_i32 : i32
    %1 = arith.extui %0 : i1 to i32
    %c0_i32_0 = arith.constant 0 : i32
    %2 = arith.cmpi ne, %1, %c0_i32_0 : i32
    scf.if %2 {
      %cst_10 = arith.constant 0.000000e+00 : f32
      %12 = vector.broadcast %cst_10 : f32 to vector<32x256xf32>
      %c0_11 = arith.constant 0 : index
      %c0_12 = arith.constant 0 : index
      %13 = vector.load %arg7[%c0_11, %c0_12] : memref<32x256xf32, #tpu.memory_space<vmem>>, vector<32x256xf32>
      tpu.vector_store %arg7[%c0_11, %c0_12], %12 {strides = array<i32>} : memref<32x256xf32, #tpu.memory_space<vmem>>, vector<32x256xf32>,
    } else {
    }
    %c0 = arith.constant 0 : index
    %c0_1 = arith.constant 0 : index
    %3 = vector.load %arg7[%c0, %c0_1] : memref<32x256xf32, #tpu.memory_space<vmem>>, vector<32x256xf32>
    %c0_2 = arith.constant 0 : index
    %c0_3 = arith.constant 0 : index
    %4 = vector.load %arg2[%c0_2, %c0_3] : memref<32x384xbf16, #tpu.memory_space<vmem>>, vector<32x384xbf16>
    %c0_4 = arith.constant 0 : index
    %c0_5 = arith.constant 0 : index
    %5 = vector.load %arg3[%c0_4, %c0_5] : memref<384x256xbf16, #tpu.memory_space<vmem>>, vector<384x256xbf16>
    %cst = arith.constant dense<0.000000e+00> : vector<32x256xf32>
    %6 = tpu.matmul %4, %5, %cst {dimension_numbers = #tpu.dot_dimension_numbers<[1], [0], [0], [1], [0, 0, 1, 1], [], []>} : vector<32x384xbf16>, vector<384x256xbf16>, vector<32x256xf32> -> vector<32x256xf32>
    %7 = arith.addf %3, %6 : vector<32x256xf32>
    %c0_6 = arith.constant 0 : index
    %c0_7 = arith.constant 0 : index
    %8 = vector.load %arg7[%c0_6, %c0_7] : memref<32x256xf32, #tpu.memory_space<vmem>>, vector<32x256xf32>
    tpu.vector_store %arg7[%c0_6, %c0_7], %7 {strides = array<i32>} : memref<32x256xf32, #tpu.memory_space<vmem>>, vector<32x256xf32>,
    %c0_i32_8 = arith.constant 0 : i32
    %9 = arith.cmpi eq, %arg1, %c0_i32_8 : i32
    %10 = arith.extui %9 : i1 to i32
    %c0_i32_9 = arith.constant 0 : i32
    %11 = arith.cmpi ne, %10, %c0_i32_9 : i32
    scf.if %11 {
      %c0_10 = arith.constant 0 : index
      %c0_11 = arith.constant 0 : index
      %12 = vector.load %arg7[%c0_10, %c0_11] : memref<32x256xf32, #tpu.memory_space<vmem>>, vector<32x256xf32>
      %c0_12 = arith.constant 0 : index
      %c0_13 = arith.constant 0 : index
      %13 = vector.load %arg4[%c0_12, %c0_13] : memref<1x256xf32, #tpu.memory_space<vmem>>, vector<1x256xf32>
      %14 = vector.broadcast %13 : vector<1x256xf32> to vector<32x256xf32>
      %15 = arith.addf %12, %14 : vector<32x256xf32>
      %16 = vector.extract_strided_slice %15 {offsets = [0, 0], sizes = [16, 256], strides = [1, 1]} : vector<32x256xf32> to vector<16x256xf32>
      %17 = arith.mulf %16, %16 : vector<16x256xf32>
      %cst_14 = arith.constant dense<0.000000e+00> : vector<256xf32>
      %18 = vector.multi_reduction <add>, %17, %cst_14 [0] : vector<16x256xf32> to vector<256xf32>
      %19 = vector.shape_cast %18 : vector<256xf32> to vector<1x256xf32>
      %c0_15 = arith.constant 0 : index
      %c0_16 = arith.constant 0 : index
      %20 = vector.load %arg5[%c0_15, %c0_16] : memref<256x256xf32, #tpu.memory_space<vmem>>, vector<256x256xf32>
      %cst_17 = arith.constant dense<0.000000e+00> : vector<1x256xf32>
      %21 = tpu.matmul %19, %20, %cst_17 {dimension_numbers = #tpu.dot_dimension_numbers<[1], [0], [0], [1], [0, 0, 1, 1], [], []>} : vector<1x256xf32>, vector<256x256xf32>, vector<1x256xf32> -> vector<1x256xf32>
      %cst_18 = arith.constant 1.000000e+00 : f32
      %22 = vector.broadcast %cst_18 : f32 to vector<1x256xf32>
      %23 = arith.addf %22, %21 : vector<1x256xf32>
      %24 = arith.divf %21, %23 : vector<1x256xf32>
      %25 = math.rsqrt %21 : vector<1x256xf32>
      %26 = arith.mulf %24, %25 : vector<1x256xf32>
      %27 = vector.broadcast %26 : vector<1x256xf32> to vector<16x256xf32>
      %28 = arith.mulf %16, %27 : vector<16x256xf32>
      %c0_19 = arith.constant 0 : index
      %c0_20 = arith.constant 0 : index
      %c0_21 = arith.constant 0 : index
      %29 = vector.load %arg6[%c0_19, %c0_20, %c0_21] : memref<2x16x256xf32, #tpu.memory_space<vmem>>, vector<1x16x256xf32>
      %30 = vector.shape_cast %29 : vector<1x16x256xf32> to vector<16x256xf32>
      %31 = vector.shape_cast %28 : vector<16x256xf32> to vector<1x16x256xf32>
      tpu.vector_store %arg6[%c0_19, %c0_20, %c0_21], %31 {strides = array<i32>} : memref<2x16x256xf32, #tpu.memory_space<vmem>>, vector<1x16x256xf32>,
      %32 = vector.extract_strided_slice %15 {offsets = [16, 0], sizes = [16, 256], strides = [1, 1]} : vector<32x256xf32> to vector<16x256xf32>
      %33 = arith.mulf %32, %32 : vector<16x256xf32>
      %cst_22 = arith.constant dense<0.000000e+00> : vector<256xf32>
      %34 = vector.multi_reduction <add>, %33, %cst_22 [0] : vector<16x256xf32> to vector<256xf32>
      %35 = vector.shape_cast %34 : vector<256xf32> to vector<1x256xf32>
      %c0_23 = arith.constant 0 : index
      %c0_24 = arith.constant 0 : index
      %36 = vector.load %arg5[%c0_23, %c0_24] : memref<256x256xf32, #tpu.memory_space<vmem>>, vector<256x256xf32>
      %cst_25 = arith.constant dense<0.000000e+00> : vector<1x256xf32>
      %37 = tpu.matmul %35, %36, %cst_25 {dimension_numbers = #tpu.dot_dimension_numbers<[1], [0], [0], [1], [0, 0, 1, 1], [], []>} : vector<1x256xf32>, vector<256x256xf32>, vector<1x256xf32> -> vector<1x256xf32>
      %cst_26 = arith.constant 1.000000e+00 : f32
      %38 = vector.broadcast %cst_26 : f32 to vector<1x256xf32>
      %39 = arith.addf %38, %37 : vector<1x256xf32>
      %40 = arith.divf %37, %39 : vector<1x256xf32>
      %41 = math.rsqrt %37 : vector<1x256xf32>
      %42 = arith.mulf %40, %41 : vector<1x256xf32>
      %43 = vector.broadcast %42 : vector<1x256xf32> to vector<16x256xf32>
      %44 = arith.mulf %32, %43 : vector<16x256xf32>
      %c1 = arith.constant 1 : index
      %c0_27 = arith.constant 0 : index
      %c0_28 = arith.constant 0 : index
      %45 = vector.load %arg6[%c1, %c0_27, %c0_28] : memref<2x16x256xf32, #tpu.memory_space<vmem>>, vector<1x16x256xf32>
      %46 = vector.shape_cast %45 : vector<1x16x256xf32> to vector<16x256xf32>
      %47 = vector.shape_cast %44 : vector<16x256xf32> to vector<1x16x256xf32>
      tpu.vector_store %arg6[%c1, %c0_27, %c0_28], %47 {strides = array<i32>} : memref<2x16x256xf32, #tpu.memory_space<vmem>>, vector<1x16x256xf32>,
    } else {
    }
    return
  }
  func.func @transform_0(%arg0: i32, %arg1: i32) -> (i32, i32) {
    %c0_i32 = arith.constant 0 : i32
    return %arg0, %arg1 : i32, i32
  }
  func.func @transform_1(%arg0: i32, %arg1: i32) -> (i32, i32) {
    %c0_i32 = arith.constant 0 : i32
    %c0_i32_0 = arith.constant 0 : i32
    return %arg1, %c0_i32 : i32, i32
  }
  func.func @transform_2(%arg0: i32, %arg1: i32) -> (i32, i32) {
    %c0_i32 = arith.constant 0 : i32
    %c0_i32_0 = arith.constant 0 : i32
    %c0_i32_1 = arith.constant 0 : i32
    return %c0_i32, %c0_i32_0 : i32, i32
  }
  func.func @transform_3(%arg0: i32, %arg1: i32) -> (i32, i32) {
    %c0_i32 = arith.constant 0 : i32
    %c0_i32_0 = arith.constant 0 : i32
    %c0_i32_1 = arith.constant 0 : i32
    return %c0_i32, %c0_i32_0 : i32, i32
  }
  func.func @transform_4(%arg0: i32, %arg1: i32) -> (i32, i32, i32) {
    %c0_i32 = arith.constant 0 : i32
    %c0_i32_0 = arith.constant 0 : i32
    %c0_i32_1 = arith.constant 0 : i32
    return %arg0, %c0_i32, %c0_i32_0 : i32, i32, i32
  }
}

</mosaic_0001>

<bundles_post_ra>
// kernel: tpu_custom_call.1
= control target key start
LH: loop header
LB: loop body
LE: loop exit
PB: predicated region body
PF: predicated region fallthrough
CT: control target
= control target key end

     0   :  { %9 = vsyncpa [#allocation4], 0  ;;  %s1895_s0 = inlined_call_operand.hbm [shape: bf16[32,384], index: 0, kind: input, shape index: {}]   ;;  %s1896_s1 = inlined_call_operand.hbm [shape: bf16[384,256], index: 1, kind: input, shape index: {}]   ;;  %s1897_s2 = inlined_call_operand.hbm [shape: f32[1,256], index: 2, kind: input, shape index: {}]   ;;  %s1898_s3 = inlined_call_operand.hbm [shape: f32[256,256], index: 3, kind: input, shape index: {}]   ;;  %s1899_s4 = inlined_call_operand.hbm [shape: f32[2,16,256], index: 4, kind: output, shape index: {}]  }
   0x1   :  { %10 = vsyncpa [#allocation7], 0 }
   0x2   :  { %11 = vsyncpa [#allocation10], 0  ;;  %s30_s17 = sshll.u32 %s1896_s1, 4  ;;  %s31_s17 = int_to_ptr.hbm [resolvable:$true] %s30_s17 }
   0x3   :  { %12 = vsyncpa [#allocation5], 0  ;;  %s1481_s18 = smov [#allocation6]   ;;  %s17_s22 = sshll.u32 %s1895_s0, 4  ;;  %s18_s22 = int_to_ptr.hbm [resolvable:$true] %s17_s22 }
   0x4   :  { %s32_s19 = sshll.u32 %s1481_s18, 4  ;;  %s1482_s23 = smov 128   ;;  %s33_s19 = int_to_ptr.vmem [resolvable:$true] %s32_s19 }
   0x5   :  { %s1483_s24 = smov 8   ;;  %s1484_s25 = smov [#allocation3]  }
   0x6   :  { %38 = dma.hbm_to_vmem [thread:$0]  %s31_s17, 6144, %s33_s19, [#allocation7], %s1482_s23, %s1482_s23, %s1483_s24  }
   0x7   :  { %s19_s26 = sshll.u32 %s1484_s25, 4  ;;  %s1485_s27 = smov 192   ;;  %s20_s26 = int_to_ptr.vmem [resolvable:$true] %s19_s26 }
   0x8   :  { %s1486_s28 = smov 12   ;;  %s44_s30 = sshll.u32 %s1897_s2, 4  ;;  %s45_s30 = int_to_ptr.hbm [resolvable:$true] %s44_s30 }
   0x9   :  { %25 = dma.hbm_to_vmem [thread:$0]  %s18_s22, 768, %s20_s26, [#allocation4], %s1485_s27, %s1485_s27, %s1486_s28  }
   0xa   :  { %s1487_s5 = smov [#allocation8]   ;;  %s54_s8 = sshll.u32 %s1898_s3, 4  ;;  %s55_s8 = int_to_ptr.hbm [resolvable:$true] %s54_s8 }
   0xb   :  { %s46_s6 = sshll.u32 %s1487_s5, 4  ;;  %s1488_s9 = smov [#allocation9]   ;;  %s47_s6 = int_to_ptr.vmem [resolvable:$true] %s46_s6 }
   0xc   :  { %49 = dma.hbm_to_vmem [thread:$0]  %s45_s30, 32, %s47_s6, [#allocation7]  }
   0xd   :  { %s56_s10 = sshll.u32 %s1488_s9, 4  ;;  %s1489_s11 = smov 256   ;;  %s57_s10 = int_to_ptr.vmem [resolvable:$true] %s56_s10 }
   0xe   :  { %s1490_s12 = smov 16  }
   0xf   :  { %62 = dma.hbm_to_vmem [thread:$0]  %s55_s8, 8192, %s57_s10, [#allocation10], %s1489_s11, %s1489_s11, %s1490_s12  }
  0x10   :  { %1473 = dma.done.wait [#allocation4], 768  }
  0x11   :  { %1474 = vsyncadd [#allocation4], 4294966528 }
  0x12   :  { %1475 = dma.done.wait [#allocation7], 6176  }
  0x13   :  { %1476 = vsyncadd [#allocation7], 4294961120 }
  0x14   :  { %1477 = dma.done.wait [#allocation10], 8192  }
  0x15   :  { %1478 = vsyncadd [#allocation10], 4294959104  ;;  %v1138_v0 = vld [vmem:[#allocation6 + $0x70] sm:$0xf]  ;;  %v1293_v1 = vld [vmem:[#allocation6 + $0x74] sm:$0xf0] }
  0x16   :  { %v1202_v2 = vld [vmem:[#allocation6 + $0xf0] sm:$0xf]  ;;  %v1139_v3 = vor.u32 %v1293_v1, %v1138_v0  ;;  %v1309_v4 = vld [vmem:[#allocation6 + $0xf4] sm:$0xf0]  ;;  %v1130_v9 = vld [vmem:[#allocation6 + $0x60] sm:$0xf] }
  0x17   :  { %v1266_v5 = vld [vmem:[#allocation6 + $0x170] sm:$0xf]  ;;  %v1325_v6 = vld [vmem:[#allocation6 + $0x174] sm:$0xf0]  ;;  %v1203_v7 = vor.u32 %v1309_v4, %v1202_v2  ;;  %v1291_v10 = vld [vmem:[#allocation6 + $0x64] sm:$0xf0] }
  0x18   :  { %v1267_v8 = vor.u32 %v1325_v6, %v1266_v5  ;;  %v1194_v11 = vld [vmem:[#allocation6 + $0xe0] sm:$0xf]  ;;  %427 = vmatpush.bf16.msra.mxu0 %v1139_v3  ;;  %v1131_v12 = vor.u32 %v1291_v10, %v1130_v9  ;;  %v1307_v13 = vld [vmem:[#allocation6 + $0xe4] sm:$0xf0]  ;;  %v1122_v18 = vld [vmem:[#allocation6 + $0x50] sm:$0xf] }
  0x19   :  { %v1258_v14 = vld [vmem:[#allocation6 + $0x160] sm:$0xf]  ;;  %v1323_v15 = vld [vmem:[#allocation6 + $0x164] sm:$0xf0]  ;;  %446 = vmatpush.bf16.msra.mxu1 %v1203_v7  ;;  %v1195_v16 = vor.u32 %v1307_v13, %v1194_v11  ;;  %v1289_v19 = vld [vmem:[#allocation6 + $0x54] sm:$0xf0] }
  0x1a   :  { %465 = vmatpush.bf16.msra.mxu2 %v1267_v8  ;;  %v1259_v17 = vor.u32 %v1323_v15, %v1258_v14  ;;  %v1186_v20 = vld [vmem:[#allocation6 + $0xd0] sm:$0xf]  ;;  %v1305_v21 = vld [vmem:[#allocation6 + $0xd4] sm:$0xf0]  ;;  %v1123_v24 = vor.u32 %v1289_v19, %v1122_v18  ;;  %v1114_v27 = vld [vmem:[#allocation6 + $0x40] sm:$0xf] }
  0x1b   :  { %v1250_v22 = vld [vmem:[#allocation6 + $0x150] sm:$0xf]  ;;  %v1321_v23 = vld [vmem:[#allocation6 + $0x154] sm:$0xf0]  ;;  %v1187_v25 = vor.u32 %v1305_v21, %v1186_v20  ;;  %v1287_v28 = vld [vmem:[#allocation6 + $0x44] sm:$0xf0] }
  0x1c   :  { %428 = vmatpush.bf16.msra.mxu0 %v1131_v12  ;;  %v1251_v26 = vor.u32 %v1321_v23, %v1250_v22  ;;  %v1178_v29 = vld [vmem:[#allocation6 + $0xc0] sm:$0xf]  ;;  %v1303_v30 = vld [vmem:[#allocation6 + $0xc4] sm:$0xf0]  ;;  %v1292_v33 = vld [vmem:[#allocation6 + $0x74] sm:$0xf]  ;;  %v1115_v35 = vor.u32 %v1287_v28, %v1114_v27 }
  0x1d   :  { %447 = vmatpush.bf16.msra.mxu1 %v1195_v16  ;;  %v1242_v31 = vld [vmem:[#allocation6 + $0x140] sm:$0xf]  ;;  %v1319_v32 = vld [vmem:[#allocation6 + $0x144] sm:$0xf0]  ;;  %v1140_v34 = vld [vmem:[#allocation6 + $0x78] sm:$0xf0]  ;;  %v1179_v39 = vor.u32 %v1303_v30, %v1178_v29 }
  0x1e   :  { %466 = vmatpush.bf16.msra.mxu2 %v1259_v17  ;;  %v1106_v36 = vld [vmem:[#allocation6 + $0x30] sm:$0xf]  ;;  %v1285_v37 = vld [vmem:[#allocation6 + $0x34] sm:$0xf0]  ;;  %v1143_v38 = vor.u32 %v1292_v33, %v1140_v34  ;;  %v1243_v40 = vor.u32 %v1319_v32, %v1242_v31  ;;  %v1290_v43 = vld [vmem:[#allocation6 + $0x64] sm:$0xf] }
  0x1f   :  { %v1170_v41 = vld [vmem:[#allocation6 + $0xb0] sm:$0xf]  ;;  %v1301_v42 = vld [vmem:[#allocation6 + $0xb4] sm:$0xf0]  ;;  %v1132_v46 = vld [vmem:[#allocation6 + $0x68] sm:$0xf0]  ;;  %v1107_v48 = vor.u32 %v1285_v37, %v1106_v36 }
  0x20   :  { %429 = vmatpush.bf16.msra.mxu0 %v1123_v24  ;;  %v1234_v44 = vld [vmem:[#allocation6 + $0x130] sm:$0xf]  ;;  %v1317_v45 = vld [vmem:[#allocation6 + $0x134] sm:$0xf0]  ;;  %484 = vmatpush.bf16.msra.mxu3 %v1143_v38  ;;  %v1135_v47 = vor.u32 %v1290_v43, %v1132_v46  ;;  %v1288_v49 = vld [vmem:[#allocation6 + $0x54] sm:$0xf]  ;;  %v1171_v51 = vor.u32 %v1301_v42, %v1170_v41 }
  0x21   :  { %448 = vmatpush.bf16.msra.mxu1 %v1187_v25  ;;  %v1124_v50 = vld [vmem:[#allocation6 + $0x58] sm:$0xf0]  ;;  %v1235_v52 = vor.u32 %v1317_v45, %v1234_v44  ;;  %v1098_v53 = vld [vmem:[#allocation6 + $0x20] sm:$0xf]  ;;  %v1283_v54 = vld [vmem:[#allocation6 + $0x24] sm:$0xf0] }
  0x22   :  { %467 = vmatpush.bf16.msra.mxu2 %v1251_v26  ;;  %v1162_v55 = vld [vmem:[#allocation6 + $0xa0] sm:$0xf]  ;;  %v1299_v56 = vld [vmem:[#allocation6 + $0xa4] sm:$0xf0]  ;;  %v1127_v59 = vor.u32 %v1288_v49, %v1124_v50  ;;  %v1286_v60 = vld [vmem:[#allocation6 + $0x44] sm:$0xf]  ;;  %v1099_v62 = vor.u32 %v1283_v54, %v1098_v53 }
  0x23   :  { %v1226_v57 = vld [vmem:[#allocation6 + $0x120] sm:$0xf]  ;;  %v1315_v58 = vld [vmem:[#allocation6 + $0x124] sm:$0xf0]  ;;  %v1116_v61 = vld [vmem:[#allocation6 + $0x48] sm:$0xf0]  ;;  %v1163_v63 = vor.u32 %v1299_v56, %v1162_v55 }
  0x24   :  { %430 = vmatpush.bf16.msra.mxu0 %v1115_v35  ;;  %485 = vmatpush.bf16.msra.mxu3 %v1135_v47  ;;  %v1227_v0 = vor.u32 %v1315_v58, %v1226_v57  ;;  %v1090_v1 = vld [vmem:[#allocation6 + $0x10] sm:$0xf]  ;;  %v1281_v2 = vld [vmem:[#allocation6 + $0x14] sm:$0xf0]  ;;  %v1119_v7 = vor.u32 %v1286_v60, %v1116_v61  ;;  %v1284_v8 = vld [vmem:[#allocation6 + $0x34] sm:$0xf] }
  0x25   :  { %449 = vmatpush.bf16.msra.mxu1 %v1179_v39  ;;  %v1154_v3 = vld [vmem:[#allocation6 + $0x90] sm:$0xf]  ;;  %v1297_v4 = vld [vmem:[#allocation6 + $0x94] sm:$0xf0]  ;;  %v1108_v9 = vld [vmem:[#allocation6 + $0x38] sm:$0xf0]  ;;  %v1091_v10 = vor.u32 %v1281_v2, %v1090_v1 }
  0x26   :  { %468 = vmatpush.bf16.msra.mxu2 %v1243_v40  ;;  %v1218_v5 = vld [vmem:[#allocation6 + $0x110] sm:$0xf]  ;;  %v1313_v6 = vld [vmem:[#allocation6 + $0x114] sm:$0xf0]  ;;  %v1082_v11 = vld [vmem:[#allocation6] sm:$0xf]  ;;  %v1155_v14 = vor.u32 %v1297_v4, %v1154_v3  ;;  %v1111_v22 = vor.u32 %v1284_v8, %v1108_v9 }
  0x27   :  { %v1279_v12 = vld [vmem:[#allocation6 + $0x4] sm:$0xf0]  ;;  %v1146_v13 = vld [vmem:[#allocation6 + $0x80] sm:$0xf]  ;;  %v1219_v15 = vor.u32 %v1313_v6, %v1218_v5  ;;  %v1058_v19 = vld [vmem:[#allocation3] sm:$0xf] }
  0x28   :  { %431 = vmatpush.bf16.msra.mxu0 %v1107_v48  ;;  %486 = vmatpush.bf16.msra.mxu3 %v1127_v59  ;;  %v1295_v16 = vld [vmem:[#allocation6 + $0x84] sm:$0xf0]  ;;  %v1210_v17 = vld [vmem:[#allocation6 + $0x100] sm:$0xf]  ;;  %v1273_v20 = vld [vmem:[#allocation3 + $0x8] sm:$0xf0]  ;;  %v1083_v26 = vor.u32 %v1279_v12, %v1082_v11 }
  0x29   :  { %450 = vmatpush.bf16.msra.mxu1 %v1171_v51  ;;  %v1311_v18 = vld [vmem:[#allocation6 + $0x104] sm:$0xf0]  ;;  %v1308_v21 = vld [vmem:[#allocation6 + $0xf4] sm:$0xf]  ;;  %v1204_v23 = vld [vmem:[#allocation6 + $0xf8] sm:$0xf0]  ;;  %v1147_v30 = vor.u32 %v1295_v16, %v1146_v13  ;;  %v1059_v38 = vor.u32 %v1273_v20, %v1058_v19 }
  0x2a   :  { %469 = vmatpush.bf16.msra.mxu2 %v1235_v52  ;;  %v1324_v24 = vld [vmem:[#allocation6 + $0x174] sm:$0xf]  ;;  %v1268_v25 = vld [vmem:[#allocation6 + $0x178] sm:$0xf0]  ;;  %v1282_v28 = vld [vmem:[#allocation6 + $0x24] sm:$0xf]  ;;  %v1211_v31 = vor.u32 %v1311_v18, %v1210_v17  ;;  %v1207_v35 = vor.u32 %v1308_v21, %v1204_v23 }
  0x2b   :  { %v1272_v27 = vld [vmem:[#allocation3 + $0x4] sm:$0xf]  ;;  %v1100_v29 = vld [vmem:[#allocation6 + $0x28] sm:$0xf0]  ;;  %v1060_v32 = vld [vmem:[#allocation3 + $0xc] sm:$0xf0]  ;;  %v1271_v36 = vor.u32 %v1324_v24, %v1268_v25 }
  0x2c   :  { %432 = vmatpush.bf16.msra.mxu0 %v1099_v62  ;;  %487 = vmatpush.bf16.msra.mxu3 %v1119_v7  ;;  %v1066_v33 = vld [vmem:[#allocation3 + $0x8] sm:$0xf]  ;;  %v1274_v34 = vld [vmem:[#allocation3 + $0x10] sm:$0xf0]  ;;  %v1196_v39 = vld [vmem:[#allocation6 + $0xe8] sm:$0xf0]  ;;  %v1103_v42 = vor.u32 %v1282_v28, %v1100_v29  ;;  %v1532_v43 = vor.u32 %v1272_v27, %v1060_v32 }
  0x2d   :  { %451 = vmatpush.bf16.msra.mxu1 %v1163_v63  ;;  %v1306_v37 = vld [vmem:[#allocation6 + $0xe4] sm:$0xf]  ;;  %v1260_v41 = vld [vmem:[#allocation6 + $0x168] sm:$0xf0]  ;;  %v1534_v44 = vor.u32 %v1274_v34, %v1066_v33  ;;  %v1280_v45 = vld [vmem:[#allocation6 + $0x14] sm:$0xf] }
  0x2e   :  { %470 = vmatpush.bf16.msra.mxu2 %v1227_v0  ;;  %v1322_v40 = vld [vmem:[#allocation6 + $0x164] sm:$0xf]  ;;  %v1092_v46 = vld [vmem:[#allocation6 + $0x18] sm:$0xf0]  ;;  %v1199_v47 = vor.u32 %v1306_v37, %v1196_v39  ;;  %v1304_v49 = vld [vmem:[#allocation6 + $0xd4] sm:$0xf] }
  0x2f   :  { %v1263_v48 = vor.u32 %v1322_v40, %v1260_v41  ;;  %v1188_v50 = vld [vmem:[#allocation6 + $0xd8] sm:$0xf0]  ;;  %v1320_v51 = vld [vmem:[#allocation6 + $0x154] sm:$0xf]  ;;  %v1095_v53 = vor.u32 %v1280_v45, %v1092_v46  ;;  %v1278_v54 = vld [vmem:[#allocation6 + $0x4] sm:$0xf] }
  0x30   :  { %433 = vmatpush.bf16.msra.mxu0 %v1091_v10  ;;  %488 = vmatpush.bf16.msra.mxu3 %v1111_v22  ;;  %v1252_v52 = vld [vmem:[#allocation6 + $0x158] sm:$0xf0]  ;;  %v1084_v55 = vld [vmem:[#allocation6 + $0x8] sm:$0xf0]  ;;  %v1191_v56 = vor.u32 %v1304_v49, %v1188_v50  ;;  %v1302_v58 = vld [vmem:[#allocation6 + $0xc4] sm:$0xf] }
  0x31   :  { %452 = vmatpush.bf16.msra.mxu1 %v1155_v14  ;;  %v1255_v57 = vor.u32 %v1320_v51, %v1252_v52  ;;  %v1180_v59 = vld [vmem:[#allocation6 + $0xc8] sm:$0xf0]  ;;  %v1318_v60 = vld [vmem:[#allocation6 + $0x144] sm:$0xf]  ;;  %v1087_v62 = vor.u32 %v1278_v54, %v1084_v55  ;;  %v1300_v1 = vld [vmem:[#allocation6 + $0xb4] sm:$0xf] }
  0x32   :  { %471 = vmatpush.bf16.msra.mxu2 %v1219_v15  ;;  %v1244_v61 = vld [vmem:[#allocation6 + $0x148] sm:$0xf0]  ;;  %v1183_v63 = vor.u32 %v1302_v58, %v1180_v59  ;;  %v1172_v2 = vld [vmem:[#allocation6 + $0xb8] sm:$0xf0]  ;;  %v1316_v3 = vld [vmem:[#allocation6 + $0x134] sm:$0xf] }
  0x33   :  { %v1247_v0 = vor.u32 %v1318_v60, %v1244_v61  ;;  %v1236_v4 = vld [vmem:[#allocation6 + $0x138] sm:$0xf0]  ;;  %v1070_v5 = vld [vmem:[#allocation3 + $0x18] sm:$0xf]  ;;  %v1276_v6 = vld [vmem:[#allocation3 + $0x20] sm:$0xf0]  ;;  %v1175_v11 = vor.u32 %v1300_v1, %v1172_v2 }
  0x34   :  { %434 = vmatpush.bf16.msra.mxu0 %v1083_v26  ;;  %489 = vmatpush.bf16.msra.mxu3 %v1103_v42  ;;  %v1275_v7 = vld [vmem:[#allocation3 + $0x1c] sm:$0xf]  ;;  %v1072_v8 = vld [vmem:[#allocation3 + $0x24] sm:$0xf0]  ;;  %v1078_v9 = vld [vmem:[#allocation3 + $0x20] sm:$0xf]  ;;  %v1239_v12 = vor.u32 %v1316_v3, %v1236_v4  ;;  %v1071_v14 = vor.u32 %v1276_v6, %v1070_v5 }
  0x35   :  { %453 = vmatpush.bf16.msra.mxu1 %v1147_v30  ;;  %v1277_v10 = vld [vmem:[#allocation3 + $0x28] sm:$0xf0]  ;;  %v1298_v13 = vld [vmem:[#allocation6 + $0xa4] sm:$0xf]  ;;  %v1164_v15 = vld [vmem:[#allocation6 + $0xa8] sm:$0xf0]  ;;  %v1075_v18 = vor.u32 %v1275_v7, %v1072_v8 }
  0x36   :  { %472 = vmatpush.bf16.msra.mxu2 %v1211_v31  ;;  %v1314_v16 = vld [vmem:[#allocation6 + $0x124] sm:$0xf]  ;;  %v1228_v17 = vld [vmem:[#allocation6 + $0x128] sm:$0xf0]  ;;  %v1079_v19 = vor.u32 %v1277_v10, %v1078_v9  ;;  %v1167_v20 = vor.u32 %v1298_v13, %v1164_v15  ;;  %v1296_v22 = vld [vmem:[#allocation6 + $0x94] sm:$0xf] }
  0x37   :  { %435 = vmatmul.bf16.vlgmr.msra.gmra.mxu0 %v1059_v38  ;;  %v1231_v21 = vor.u32 %v1314_v16, %v1228_v17  ;;  %v1156_v23 = vld [vmem:[#allocation6 + $0x98] sm:$0xf0]  ;;  %v1312_v24 = vld [vmem:[#allocation6 + $0x114] sm:$0xf]  ;;  %v1540_v27 = vld [vmem:[#allocation9 + $0xe0] sm:$0xff]  ;;  %s1491_s2 = smov [#allocation11]  }
  0x38   :  { %503 = vmatpush.bf16.msrb.mxu0 %v1207_v35  ;;  %454 = vmatmul.bf16.vlgmr.msra.gmra.mxu1 %v1532_v43  ;;  %v1220_v25 = vld [vmem:[#allocation6 + $0x118] sm:$0xf0]  ;;  %v1538_v26 = vld [vmem:[#allocation9 + $0xf0] sm:$0xff]  ;;  %v1159_v28 = vor.u32 %v1296_v22, %v1156_v23  ;;  %v1294_v30 = vld [vmem:[#allocation6 + $0x84] sm:$0xf]  ;;  %s1039_s3 = sshll.u32 %s1491_s2, 4  ;;  %s1040_s3 = int_to_ptr.vmem [resolvable:$true] %s1039_s3 }
  0x39   :  { %522 = vmatpush.bf16.msrb.mxu1 %v1271_v36  ;;  %473 = vmatmul.bf16.vlgmr.msra.gmra.mxu2 %v1534_v44  ;;  %v1223_v29 = vor.u32 %v1312_v24, %v1220_v25  ;;  %v1543_v31 = vld [vmem:[#allocation9 + $0xd0] sm:$0xff]  ;;  %v1148_v32 = vld [vmem:[#allocation6 + $0x88] sm:$0xf0]  ;;  %v1310_v33 = vld [vmem:[#allocation6 + $0x104] sm:$0xf]  ;;  %s1041_s15 = sshll.u32 %s1899_s4, 4  ;;  %s1042_s15 = int_to_ptr.hbm [resolvable:$true] %s1041_s15 }
  0x3a   :  { %490 = vmatpush.bf16.msra.mxu3 %v1095_v53  ;;  %664 = vmatpush.msrb.mxu2 %v1538_v26  ;;  %v1212_v34 = vld [vmem:[#allocation6 + $0x108] sm:$0xf0]  ;;  %v1546_v35 = vld [vmem:[#allocation9 + $0xc0] sm:$0xff]  ;;  %v1151_v36 = vor.u32 %v1294_v30, %v1148_v32  ;;  %v1552_v39 = vld [vmem:[#allocation9 + $0xf8] sm:$0xff] }
  0x3b   :  { %v1215_v37 = vor.u32 %v1310_v33, %v1212_v34  ;;  %v1555_v40 = vld [vmem:[#allocation9 + $0xa0] sm:$0xff]  ;;  %v1557_v41 = vld [vmem:[#allocation9 + $0xe8] sm:$0xff]  ;;  %v1562_v42 = vld [vmem:[#allocation9 + $0xd8] sm:$0xff] }
  0x3c   :  { %504 = vmatpush.bf16.msrb.mxu0 %v1199_v47  ;;  %665 = vmatpush.msrb.mxu2 %v1540_v27  ;;  %v1565_v45 = vld [vmem:[#allocation9 + $0xc8] sm:$0xff]  ;;  %v1569_v46 = vld [vmem:[#allocation9 + $0xb8] sm:$0xff]  ;;  %v1586_v50 = vld [vmem:[#allocation9 + $0x70] sm:$0xff] }
  0x3d   :  { %523 = vmatpush.bf16.msrb.mxu1 %v1263_v48  ;;  %v1572_v47 = vld [vmem:[#allocation9 + $0xa8] sm:$0xff]  ;;  %v1576_v48 = vld [vmem:[#allocation9 + $0x90] sm:$0xff]  ;;  %v1588_v51 = vld [vmem:[#allocation9 + $0x78] sm:$0xff] }
  0x3e   :  { %491 = vmatpush.bf16.msra.mxu3 %v1087_v62  ;;  %666 = vmatpush.msrb.mxu2 %v1543_v31  ;;  %v1584_v49 = vld [vmem:[#allocation9 + $0x88] sm:$0xff]  ;;  %v1594_v52 = vld [vmem:[#allocation9 + $0x60] sm:$0xff]  ;;  %v1600_v54 = vld [vmem:[#allocation9 + $0x50] sm:$0xff] }
  0x3f   :  { %v1596_v53 = vld [vmem:[#allocation9 + $0x68] sm:$0xff]  ;;  %v1602_v55 = vld [vmem:[#allocation9 + $0x58] sm:$0xff]  ;;  %v1612_v58 = vld [vmem:[#allocation9 + $0x30] sm:$0xff] }
  0x40   :  { %505 = vmatpush.bf16.msrb.mxu0 %v1191_v56  ;;  %667 = vmatpush.msrb.mxu2 %v1546_v35  ;;  %v1606_v56 = vld [vmem:[#allocation9 + $0x40] sm:$0xff]  ;;  %v1614_v59 = vld [vmem:[#allocation9 + $0x38] sm:$0xff]  ;;  %v1620_v61 = vld [vmem:[#allocation9 + $0x28] sm:$0xff] }
  0x41   :  { %524 = vmatpush.bf16.msrb.mxu1 %v1255_v57  ;;  %492 = vmatmul.bf16.vlgmr.msra.gmra.mxu3 %v1059_v38  ;;  %v1549_v38 = vld [vmem:[#allocation9 + $0xb0] sm:$0xff]  ;;  %v1608_v57 = vld [vmem:[#allocation9 + $0x48] sm:$0xff]  ;;  %v1618_v60 = vld [vmem:[#allocation9 + $0x20] sm:$0xff] }
  0x42   :  { %668 = vmatpush.msrb.mxu2 %v1549_v38  ;;  %v1624_v62 = vld [vmem:[#allocation9 + $0x10] sm:$0xff]  ;;  %v1632_v1 = vld [vmem:[#allocation9 + $0x1f8] sm:$0xff]  ;;  %v1636_v2 = vld [vmem:[#allocation9] sm:$0xff] }
  0x43   :  { %v1638_v3 = vld [vmem:[#allocation9 + $0x1e0] sm:$0xff]  ;;  %v1640_v4 = vld [vmem:[#allocation9 + $0x8] sm:$0xff]  ;;  %v1648_v6 = vld [vmem:[#allocation9 + $0x1d0] sm:$0xff] }
  0x44   :  { %506 = vmatpush.bf16.msrb.mxu0 %v1183_v63  ;;  %669 = vmatpush.msrb.mxu2 %v1555_v40  ;;  %v1626_v63 = vld [vmem:[#allocation9 + $0x1f0] sm:$0xff]  ;;  %v1644_v5 = vld [vmem:[#allocation9 + $0x1e8] sm:$0xff]  ;;  %v1650_v7 = vld [vmem:[#allocation9 + $0x1d8] sm:$0xff] }
  0x45   :  { %525 = vmatpush.bf16.msrb.mxu1 %v1247_v0  ;;  %v1628_v0 = vld [vmem:[#allocation9 + $0x18] sm:$0xff]  ;;  %684 = vmatpush.msrb.mxu3 %v1626_v63  ;;  %v1656_v8 = vld [vmem:[#allocation9 + $0x1c0] sm:$0xff]  ;;  %v1658_v9 = vld [vmem:[#allocation9 + $0x1c8] sm:$0xff] }
  0x46   :  { %670 = vmatpush.msrb.mxu2 %v1576_v48  ;;  %v1664_v10 = vld [vmem:[#allocation9 + $0x1b0] sm:$0xff]  ;;  %v1674_v13 = vld [vmem:[#allocation9 + $0x1a8] sm:$0xff]  ;;  %v1680_v15 = vld [vmem:[#allocation9 + $0x198] sm:$0xff] }
  0x47   :  { %440 = vmatmul.bf16.gmra.mxu0 %v1071_v14  ;;  %685 = vmatpush.msrb.mxu3 %v1638_v3  ;;  %v1688_v16 = vld [vmem:[#allocation9 + $0x180] sm:$0xff]  ;;  %v1690_v17 = vld [vmem:[#allocation9 + $0x188] sm:$0xff]  ;;  %v1712_v24 = vld [vmem:[#allocation9 + $0x150] sm:$0xff] }
  0x48   :  { %507 = vmatpush.bf16.msrb.mxu0 %v1175_v11  ;;  %459 = vmatmul.bf16.gmra.mxu1 %v1075_v18  ;;  %v1666_v11 = vld [vmem:[#allocation9 + $0x1b8] sm:$0xff]  ;;  %v1704_v22 = vld [vmem:[#allocation9 + $0x160] sm:$0xff]  ;;  %v1706_v23 = vld [vmem:[#allocation9 + $0x168] sm:$0xff] }
  0x49   :  { %526 = vmatpush.bf16.msrb.mxu1 %v1239_v12  ;;  %478 = vmatmul.bf16.gmra.mxu2 %v1079_v19  ;;  %v1672_v12 = vld [vmem:[#allocation9 + $0x1a0] sm:$0xff]  ;;  %v1714_v25 = vld [vmem:[#allocation9 + $0x158] sm:$0xff]  ;;  %v1730_v32 = vld [vmem:[#allocation9 + $0x130] sm:$0xff] }
  0x4a   :  { %686 = vmatpush.msrb.mxu3 %v1648_v6  ;;  %v1726_v30 = vld [vmem:[#allocation8] sm:$0x3] }
  0x4b   :  { %v1732_v33 = vld [vmem:[#allocation9 + $0x138] sm:$0xff] }
  0x4c   :  { %508 = vmatpush.bf16.msrb.mxu0 %v1167_v20  ;;  %687 = vmatpush.msrb.mxu3 %v1656_v8  ;;  %v1696_v20 = vld [vmem:[#allocation9 + $0x170] sm:$0xff] }
  0x4d   :  { %527 = vmatpush.bf16.msrb.mxu1 %v1231_v21  ;;  %v1698_v21 = vld [vmem:[#allocation9 + $0x178] sm:$0xff] }
  0x4e   :  { %688 = vmatpush.msrb.mxu3 %v1664_v10 }
  0x50   :  { %509 = vmatpush.bf16.msrb.mxu0 %v1159_v28  ;;  %689 = vmatpush.msrb.mxu3 %v1672_v12  ;;  %v1722_v28 = vld [vmem:[#allocation9 + $0x148] sm:$0xff] }
  0x51   :  { %528 = vmatpush.bf16.msrb.mxu1 %v1223_v29  ;;  %497 = vmatmul.bf16.gmra.mxu3 %v1071_v14  ;;  %v1678_v14 = vld [vmem:[#allocation9 + $0x190] sm:$0xff] }
  0x52   :  { %690 = vmatpush.msrb.mxu3 %v1678_v14 }
  0x54   :  { %510 = vmatpush.bf16.msrb.mxu0 %v1151_v36  ;;  %691 = vmatpush.msrb.mxu3 %v1688_v16  ;;  %v1740_v36 = vld [vmem:[#allocation9 + $0x128] sm:$0xff] }
  0x55   :  { %529 = vmatpush.bf16.msrb.mxu1 %v1215_v37 }
  0x56   :  { %692 = vmatpush.msrb.mxu3 %v1696_v20 }
  0x57   :  { %511 = vmatmul.bf16.vlgmr.msrb.gmra.mxu0 %v1532_v43  ;;  %v1578_v43 = vld [vmem:[#allocation9 + $0x98] sm:$0xff] }
  0x58   :  { %704 = vmatpush.msra.mxu0 %v1552_v39  ;;  %530 = vmatmul.bf16.vlgmr.msrb.gmra.mxu1 %v1534_v44  ;;  %v1582_v44 = vld [vmem:[#allocation9 + $0x80] sm:$0xff] }
  0x59   :  { %671 = vmatpush.msrb.mxu2 %v1582_v44  ;;  %724 = vmatpush.msra.mxu1 %v1632_v1 }
  0x5a   :  { %705 = vmatpush.msra.mxu0 %v1557_v41  ;;  %693 = vmatpush.msrb.mxu3 %v1704_v22 }
  0x5b   :  { %672 = vmatpush.msrb.mxu2 %v1586_v50  ;;  %725 = vmatpush.msra.mxu1 %v1644_v5 }
  0x5c   :  { %706 = vmatpush.msra.mxu0 %v1562_v42  ;;  %694 = vmatpush.msrb.mxu3 %v1712_v24 }
  0x5d   :  { %673 = vmatpush.msrb.mxu2 %v1594_v52  ;;  %726 = vmatpush.msra.mxu1 %v1650_v7 }
  0x5e   :  { %707 = vmatpush.msra.mxu0 %v1565_v45 }
  0x5f   :  { %674 = vmatpush.msrb.mxu2 %v1600_v54  ;;  %727 = vmatpush.msra.mxu1 %v1658_v9 }
  0x60   :  { %708 = vmatpush.msra.mxu0 %v1569_v46 }
  0x61   :  { %675 = vmatpush.msrb.mxu2 %v1606_v56  ;;  %728 = vmatpush.msra.mxu1 %v1666_v11 }
  0x62   :  { %709 = vmatpush.msra.mxu0 %v1572_v47 }
  0x63   :  { %676 = vmatpush.msrb.mxu2 %v1612_v58  ;;  %729 = vmatpush.msra.mxu1 %v1674_v13 }
  0x64   :  { %710 = vmatpush.msra.mxu0 %v1578_v43 }
  0x65   :  { %677 = vmatpush.msrb.mxu2 %v1618_v60  ;;  %730 = vmatpush.msra.mxu1 %v1680_v15 }
  0x66   :  { %711 = vmatpush.msra.mxu0 %v1584_v49 }
  0x67   :  { %516 = vmatmul.bf16.gmra.mxu0 %v1075_v18  ;;  %678 = vmatpush.msrb.mxu2 %v1624_v62 }
  0x68   :  { %535 = vmatmul.bf16.gmra.mxu1 %v1079_v19  ;;  %712 = vmatpush.msra.mxu0 %v1588_v51 }
  0x69   :  { %679 = vmatpush.msrb.mxu2 %v1636_v2  ;;  %731 = vmatpush.msra.mxu1 %v1690_v17 }
  0x6a   :  { %713 = vmatpush.msra.mxu0 %v1596_v53 }
  0x6b   :  { %890 = vmatpush.msra.mxu2 %v1538_v26  ;;  %732 = vmatpush.msra.mxu1 %v1698_v21 }
  0x6c   :  { %714 = vmatpush.msra.mxu0 %v1602_v55 }
  0x6d   :  { %891 = vmatpush.msra.mxu2 %v1540_v27  ;;  %733 = vmatpush.msra.mxu1 %v1706_v23  ;;  %v1720_v27 = vld [vmem:[#allocation9 + $0x140] sm:$0xff] }
  0x6e   :  { %715 = vmatpush.msra.mxu0 %v1608_v57  ;;  %695 = vmatpush.msrb.mxu3 %v1720_v27 }
  0x6f   :  { %892 = vmatpush.msra.mxu2 %v1543_v31  ;;  %734 = vmatpush.msra.mxu1 %v1714_v25 }
  0x70   :  { %716 = vmatpush.msra.mxu0 %v1614_v59  ;;  %696 = vmatpush.msrb.mxu3 %v1730_v32 }
  0x71   :  { %893 = vmatpush.msra.mxu2 %v1546_v35  ;;  %735 = vmatpush.msra.mxu1 %v1722_v28  ;;  %v1738_v35 = vld [vmem:[#allocation9 + $0x120] sm:$0xff] }
  0x72   :  { %717 = vmatpush.msra.mxu0 %v1620_v61  ;;  %697 = vmatpush.msrb.mxu3 %v1738_v35 }
  0x73   :  { %894 = vmatpush.msra.mxu2 %v1549_v38  ;;  %736 = vmatpush.msra.mxu1 %v1732_v33  ;;  %v1743_v38 = vperm.slane %v1726_v30, 0 }
  0x74   :  { %718 = vmatpush.msra.mxu0 %v1628_v0 }
  0x75   :  { %895 = vmatpush.msra.mxu2 %v1555_v40  ;;  %737 = vmatpush.msra.mxu1 %v1740_v36  ;;  %v1751_v40 = vld [vmem:[#allocation9 + $0x118] sm:$0xff] }
  0x76   :  { %719 = vmatpush.msra.mxu0 %v1640_v4 }
  0x77   :  { %896 = vmatpush.msra.mxu2 %v1576_v48  ;;  %738 = vmatpush.msra.mxu1 %v1751_v40 }
  0x78   :  { %930 = vmatpush.msrb.mxu0 %v1552_v39  ;;  %v1749_v39 = vld [vmem:[#allocation9 + $0x110] sm:$0xff] }
  0x79   :  { %897 = vmatpush.msra.mxu2 %v1582_v44  ;;  %698 = vmatpush.msrb.mxu3 %v1749_v39 }
  0x7a   :  { %931 = vmatpush.msrb.mxu0 %v1557_v41 }
  0x7b   :  { %898 = vmatpush.msra.mxu2 %v1586_v50 }
  0x7c   :  { %932 = vmatpush.msrb.mxu0 %v1562_v42 }
  0x7d   :  { %899 = vmatpush.msra.mxu2 %v1594_v52 }
  0x7e   :  { %933 = vmatpush.msrb.mxu0 %v1565_v45  ;;  %v1757_v45 = vld [vmem:[#allocation9 + $0x100] sm:$0xff] }
  0x7f   :  { %900 = vmatpush.msra.mxu2 %v1600_v54  ;;  %699 = vmatpush.msrb.mxu3 %v1757_v45 }
  0x80   :  { %934 = vmatpush.msrb.mxu0 %v1569_v46  ;;  %v1759_v46 = vld [vmem:[#allocation9 + $0x108] sm:$0xff] }
  0x81   :  { %901 = vmatpush.msra.mxu2 %v1606_v56  ;;  %739 = vmatpush.msra.mxu1 %v1759_v46 }
  0x82   :  { %935 = vmatpush.msrb.mxu0 %v1572_v47  ;;  %910 = vmatpush.msra.mxu3 %v1626_v63 }
  0x83   :  { %902 = vmatpush.msra.mxu2 %v1612_v58  ;;  %950 = vmatpush.msrb.mxu1 %v1632_v1 }
  0x84   :  { %936 = vmatpush.msrb.mxu0 %v1578_v43  ;;  %911 = vmatpush.msra.mxu3 %v1638_v3 }
  0x85   :  { %903 = vmatpush.msra.mxu2 %v1618_v60  ;;  %951 = vmatpush.msrb.mxu1 %v1644_v5 }
  0x86   :  { %937 = vmatpush.msrb.mxu0 %v1584_v49  ;;  %912 = vmatpush.msra.mxu3 %v1648_v6 }
  0x87   :  { %904 = vmatpush.msra.mxu2 %v1624_v62  ;;  %952 = vmatpush.msrb.mxu1 %v1650_v7 }
  0x88   :  { %938 = vmatpush.msrb.mxu0 %v1588_v51  ;;  %913 = vmatpush.msra.mxu3 %v1656_v8 }
  0x89   :  { %905 = vmatpush.msra.mxu2 %v1636_v2  ;;  %953 = vmatpush.msrb.mxu1 %v1658_v9 }
  0x8a   :  { %939 = vmatpush.msrb.mxu0 %v1596_v53  ;;  %914 = vmatpush.msra.mxu3 %v1664_v10 }
  0x8b   :  { %954 = vmatpush.msrb.mxu1 %v1666_v11 }
  0x8c   :  { %940 = vmatpush.msrb.mxu0 %v1602_v55  ;;  %915 = vmatpush.msra.mxu3 %v1672_v12 }
  0x8d   :  { %955 = vmatpush.msrb.mxu1 %v1674_v13 }
  0x8e   :  { %941 = vmatpush.msrb.mxu0 %v1608_v57  ;;  %916 = vmatpush.msra.mxu3 %v1678_v14  ;;  %v571_v14 = vperm.slane %v1726_v30, 1 }
  0x8f   :  { %956 = vmatpush.msrb.mxu1 %v1680_v15 }
  0x90   :  { %942 = vmatpush.msrb.mxu0 %v1614_v59  ;;  %917 = vmatpush.msra.mxu3 %v1688_v16 }
  0x91   :  { %957 = vmatpush.msrb.mxu1 %v1690_v17 }
  0x92   :  { %943 = vmatpush.msrb.mxu0 %v1620_v61  ;;  %918 = vmatpush.msra.mxu3 %v1696_v20 }
  0x93   :  { %958 = vmatpush.msrb.mxu1 %v1698_v21 }
  0x94   :  { %944 = vmatpush.msrb.mxu0 %v1628_v0  ;;  %919 = vmatpush.msra.mxu3 %v1704_v22 }
  0x95   :  { %959 = vmatpush.msrb.mxu1 %v1706_v23 }
  0x96   :  { %945 = vmatpush.msrb.mxu0 %v1640_v4  ;;  %920 = vmatpush.msra.mxu3 %v1712_v24 }
  0x97   :  { %960 = vmatpush.msrb.mxu1 %v1714_v25 }
  0x98   :  { %921 = vmatpush.msra.mxu3 %v1720_v27 }
  0x99   :  { %961 = vmatpush.msrb.mxu1 %v1722_v28 }
  0x9a   :  { %922 = vmatpush.msra.mxu3 %v1730_v32 }
  0x9b   :  { %962 = vmatpush.msrb.mxu1 %v1732_v33 }
  0x9c   :  { %923 = vmatpush.msra.mxu3 %v1738_v35 }
  0x9d   :  { %963 = vmatpush.msrb.mxu1 %v1740_v36 }
  0x9e   :  { %924 = vmatpush.msra.mxu3 %v1749_v39 }
  0x9f   :  { %964 = vmatpush.msrb.mxu1 %v1751_v40 }
  0xa0   :  { %925 = vmatpush.msra.mxu3 %v1757_v45 }
  0xa1   :  { %965 = vmatpush.msrb.mxu1 %v1759_v46 }
  0xb4   :  { %v436_v18 = vpop.f32.mrf.mxu0 }
  0xb5   :  { %v455_v19 = vpop.f32.mrf.mxu1 }
  0xb6   :  { %v456_v34 = vadd.f32 %v455_v19, %v436_v18 }
  0xbc   :  { %v474_v26 = vpop.f32.mrf.mxu2  ;;  %v438_v29 = vpop.f32.mrf.mxu0 }
  0xbd   :  { %v457_v31 = vpop.f32.mrf.mxu1  ;;  %v475_v37 = vadd.f32 %v474_v26, %v456_v34 }
  0xbe   :  { %v458_v41 = vadd.f32 %v457_v31, %v438_v29 }
  0xbf   :  { %v1762_v47 = vadd.f32 %v1743_v38, %v475_v37 }
  0xc1   :  { %v582_v50 = vmul.f32 %v1762_v47, %v1762_v47 }
  0xc4   :  { %v476_v42 = vpop.f32.mrf.mxu2  ;;  %v441_v43 = vpop.f32.mrf.mxu0 }
  0xc5   :  { %v477_v48 = vadd.f32 %v476_v42, %v458_v41  ;;  %v460_v44 = vpop.f32.mrf.mxu1  ;;  %v493_v58 = vpop.f32.mrf.mxu3 }
  0xc6   :  { %v461_v57 = vadd.f32 %v460_v44, %v441_v43 }
  0xc7   :  { %v1769_v49 = vadd.f32 %v1743_v38, %v477_v48 }
  0xc9   :  { %v584_v51 = vmul.f32 %v1769_v49, %v1769_v49 }
  0xcb   :  { %v586_v52 = vadd.f32 %v584_v51, %v582_v50 }
  0xcc   :  { %v479_v53 = vpop.f32.mrf.mxu2  ;;  %v443_v55 = vpop.f32.mrf.mxu0 }
  0xcd   :  { %v587_v54 = vrot.slane %v586_v52, 4  ;;  %v462_v56 = vpop.f32.mrf.mxu1  ;;  %v480_v60 = vadd.f32 %v479_v53, %v461_v57  ;;  %v495_v11 = vpop.f32.mrf.mxu3 }
  0xce   :  { %v463_v62 = vadd.f32 %v462_v56, %v443_v55 }
  0xcf   :  { %v588_v59 = vadd.f32 %v587_v54, %v586_v52  ;;  %v1794_v1 = vadd.f32 %v1743_v38, %v480_v60 }
  0xd1   :  { %v589_v61 = vrot.slane %v588_v59, 2  ;;  %v808_v9 = vmul.f32 %v1794_v1, %v1794_v1 }
  0xd3   :  { %v590_v63 = vadd.f32 %v589_v61, %v588_v59 }
  0xd4   :  { %v481_v0 = vpop.f32.mrf.mxu2  ;;  %v512_v3 = vpop.f32.mrf.mxu0 }
  0xd5   :  { %v482_v2 = vadd.f32 %v481_v0, %v463_v62  ;;  %v591_v4 = vrot.slane %v590_v63, 1  ;;  %v531_v5 = vpop.f32.mrf.mxu1  ;;  %v513_v8 = vadd.f32 %v512_v3, %v493_v58  ;;  %v498_v24 = vpop.f32.mrf.mxu3 }
  0xd7   :  { %v1799_v6 = vadd.f32 %v1743_v38, %v482_v2  ;;  %v592_v7 = vadd.f32 %v591_v4, %v590_v63  ;;  %v532_v13 = vadd.f32 %v531_v5, %v513_v8 }
  0xd9   :  { %v810_v10 = vmul.f32 %v1799_v6, %v1799_v6  ;;  %680 = vmatmul.f32.vlgmr.msrb.gmra.mxu2 %v592_v7  ;;  %720 = vmatmul.f32.vlgmr.msra.gmra.mxu0 %v592_v7  ;;  %v1814_v20 = vadd.f32 %v571_v14, %v532_v13 }
  0xdb   :  { %v812_v12 = vadd.f32 %v810_v10, %v808_v9  ;;  %v583_v26 = vmul.f32 %v1814_v20, %v1814_v20 }
  0xdc   :  { %v514_v16 = vpop.f32.mrf.mxu0 }
  0xdd   :  { %v813_v15 = vrot.slane %v812_v12, 4  ;;  %v515_v17 = vadd.f32 %v514_v16, %v495_v11  ;;  %v533_v18 = vpop.f32.mrf.mxu1  ;;  %v500_v38 = vpop.f32.mrf.mxu3 }
  0xdf   :  { %v814_v19 = vadd.f32 %v813_v15, %v812_v12  ;;  %v534_v21 = vadd.f32 %v533_v18, %v515_v17 }
  0xe1   :  { %v815_v22 = vrot.slane %v814_v19, 2  ;;  %v1818_v23 = vadd.f32 %v571_v14, %v534_v21 }
  0xe3   :  { %v816_v25 = vadd.f32 %v815_v22, %v814_v19  ;;  %v585_v27 = vmul.f32 %v1818_v23, %v1818_v23 }
  0xe4   :  { %v517_v28 = vpop.f32.mrf.mxu0 }
  0xe5   :  { %v817_v29 = vrot.slane %v816_v25, 1  ;;  %v593_v30 = vadd.f32 %v585_v27, %v583_v26  ;;  %v536_v31 = vpop.f32.mrf.mxu1  ;;  %v518_v34 = vadd.f32 %v517_v28, %v498_v24 }
  0xe7   :  { %v818_v32 = vadd.f32 %v817_v29, %v816_v25  ;;  %v594_v33 = vrot.slane %v593_v30, 4  ;;  %v537_v36 = vadd.f32 %v536_v31, %v518_v34 }
  0xe9   :  { %906 = vmatmul.f32.vlgmr.msra.gmra.mxu2 %v818_v32  ;;  %946 = vmatmul.f32.vlgmr.msrb.gmra.mxu0 %v818_v32  ;;  %v595_v35 = vadd.f32 %v594_v33, %v593_v30  ;;  %v1830_v48 = vadd.f32 %v571_v14, %v537_v36 }
  0xeb   :  { %v596_v37 = vrot.slane %v595_v35, 2  ;;  %v809_v50 = vmul.f32 %v1830_v48, %v1830_v48 }
  0xec   :  { %v519_v39 = vpop.f32.mrf.mxu0 }
  0xed   :  { %v520_v41 = vadd.f32 %v519_v39, %v500_v38  ;;  %v597_v40 = vadd.f32 %v596_v37, %v595_v35  ;;  %v538_v42 = vpop.f32.mrf.mxu1 }
  0xef   :  { %v539_v43 = vadd.f32 %v538_v42, %v520_v41  ;;  %v598_v44 = vrot.slane %v597_v40, 1 }
  0xf1   :  { %v1832_v45 = vadd.f32 %v571_v14, %v539_v43  ;;  %v599_v46 = vadd.f32 %v598_v44, %v597_v40 }
  0xf3   :  { %v811_v51 = vmul.f32 %v1832_v45, %v1832_v45  ;;  %700 = vmatmul.f32.vlgmr.msrb.gmra.mxu3 %v599_v46  ;;  %740 = vmatmul.f32.vlgmr.msra.gmra.mxu1 %v599_v46 }
  0xf5   :  { %v819_v52 = vadd.f32 %v811_v51, %v809_v50 }
  0xf7   :  { %v820_v53 = vrot.slane %v819_v52, 4 }
  0xf9   :  { %v821_v54 = vadd.f32 %v820_v53, %v819_v52 }
  0xfb   :  { %v822_v55 = vrot.slane %v821_v54, 2 }
  0xfd   :  { %v823_v56 = vadd.f32 %v822_v55, %v821_v54 }
  0xff   :  { %v824_v57 = vrot.slane %v823_v56, 1 }
 0x101   :  { %v825_v58 = vadd.f32 %v824_v57, %v823_v56 }
 0x103   :  { %926 = vmatmul.f32.vlgmr.msra.gmra.mxu3 %v825_v58  ;;  %966 = vmatmul.f32.vlgmr.msrb.gmra.mxu1 %v825_v58 }
 0x156   :  { %v721_v59 = vpop.f32.mrf.mxu0 }
 0x15c   :  { %v681_v63 = vpop.f32.mrf.mxu2 }
 0x166   :  { %v947_v15 = vpop.f32.mrf.mxu0 }
 0x16c   :  { %v907_v35 = vpop.f32.mrf.mxu2 }
 0x170   :  { %v741_v60 = vpop.f32.mrf.mxu1 }
 0x171   :  { %v742_v61 = vadd.f32 %v741_v60, %v721_v59 }
 0x173   :  { %v745_v62 = vadd.f32 1.0, %v742_v61  ;;  %1337 = vrsqrt.f32 %v742_v61  ;;  %vm792_vm5 = vweird.f32 %v742_v61 }
 0x175   :  { %1339 = vrcp.f32 %v745_v62  ;;  %v772_v11 = vand.u32 2147483648, %v745_v62  ;;  %v770_v14 = vand.u32 2147483647, %v745_v62  ;;  %vm766_vm1 = vweird.f32 %v745_v62 }
 0x176   :  { %v701_v0 = vpop.f32.mrf.mxu3 }
 0x177   :  { %v1838_v2 = vadd.f32 %v701_v0, %v681_v63  ;;  %v773_v25 = vor.u32 1.1754944e-38, %v772_v11  ;;  %vm771_vm4 = vcmp.eq.f32.partialorder %v770_v14, 8.507059e+37 }
 0x179   :  { %v1338_v3 = vpop.eup %1337  ;;  %v744_v4 = vadd.f32 1.0, %v1838_v2  ;;  %1341 = vrsqrt.f32 %v1838_v2  ;;  %vm782_vm12 = vweird.f32 %v1838_v2 }
 0x17a   :  { %v787_v5 = vmul.f32 %v1338_v3, %v742_v61  ;;  %vm793_vm2 = vweird.f32 %v1338_v3 }
 0x17b   :  { %v1340_v7 = vpop.eup %1339  ;;  %1343 = vrcp.f32 %v744_v4  ;;  %v757_v32 = vand.u32 2147483648, %v744_v4  ;;  %vm794_vm6 = vmor %vm792_vm5, %vm793_vm2  ;;  %v755_v38 = vand.u32 2147483647, %v744_v4  ;;  %vm751_vm8 = vweird.f32 %v744_v4 }
 0x17c   :  { %v762_v8 = vmul.f32 %v1340_v7, %v745_v62  ;;  %v788_v9 = vmul.f32 %v1338_v3, %v787_v5  ;;  %vm767_vm0 = vweird.f32 %v1340_v7 }
 0x17d   :  { %vm768_vm3 = vmor %vm766_vm1, %vm767_vm0  ;;  %v758_v46 = vor.u32 1.1754944e-38, %v757_v32  ;;  %vm756_vm11 = vcmp.eq.f32.partialorder %v755_v38, 8.507059e+37 }
 0x17e   :  { %v763_v10 = vsub.f32 1.0, %v762_v8  ;;  %v789_v12 = vmul.f32 0.5, %v788_v9 }
 0x17f   :  { %v1842_v13 = vpop.eup %1341 }
 0x180   :  { %v764_v16 = vmul.f32 %v1340_v7, %v763_v10  ;;  %v790_v17 = vsub.f32 1.5, %v789_v12  ;;  %v777_v18 = vmul.f32 %v1842_v13, %v1838_v2  ;;  %v967_v19 = vpop.f32.mrf.mxu1  ;;  %vm783_vm10 = vweird.f32 %v1842_v13 }
 0x181   :  { %v1344_v21 = vpop.eup %1343  ;;  %v1846_v22 = vadd.f32 %v967_v19, %v947_v15  ;;  %vm784_vm13 = vmor %vm782_vm12, %vm783_vm10 }
 0x182   :  { %v765_v24 = vadd.f32 %v1340_v7, %v764_v16  ;;  %v747_v26 = vmul.f32 %v1344_v21, %v744_v4  ;;  %v791_v27 = vmul.f32 %v1338_v3, %v790_v17  ;;  %v778_v28 = vmul.f32 %v1842_v13, %v777_v18 }
 0x183   :  { %v1850_v29 = vadd.f32 1.0, %v1846_v22  ;;  %1345 = vrsqrt.f32 %v1846_v22  ;;  %vm752_vm7 = vweird.f32 %v1344_v21 }
 0x184   :  { %v769_v30 = vsel %vm768_vm3, %v1340_v7, %v765_v24  ;;  %v748_v31 = vsub.f32 1.0, %v747_v26  ;;  %v779_v34 = vmul.f32 0.5, %v778_v28  ;;  %v795_v41 = vsel %vm794_vm6, %v1338_v3, %v791_v27  ;;  %vm753_vm9 = vmor %vm751_vm8, %vm752_vm7 }
 0x185   :  { %v774_v33 = vsel %vm771_vm4, %v773_v25, %v769_v30  ;;  %1347 = vrcp.f32 %v1850_v29  ;;  %v996_v5 = vand.u32 2147483647, %v1850_v29  ;;  %v998_v7 = vand.u32 2147483648, %v1850_v29 }
 0x186   :  { %v775_v36 = vmul.f32 %v774_v33, %v742_v61  ;;  %v749_v37 = vmul.f32 %v1344_v21, %v748_v31  ;;  %v927_v39 = vpop.f32.mrf.mxu3  ;;  %v780_v40 = vsub.f32 1.5, %v779_v34  ;;  %vm992_vm15 = vweird.f32 %v1850_v29 }
 0x187   :  { %v1855_v42 = vadd.f32 %v927_v39, %v907_v35  ;;  %v999_v15 = vor.u32 1.1754944e-38, %v998_v7  ;;  %vm997_vm2 = vcmp.eq.f32.partialorder %v996_v5, 8.507059e+37  ;;  %vm1018_vm3 = vweird.f32 %v1846_v22 }
 0x188   :  { %v797_v43 = vmul.f32 %v795_v41, %v775_v36  ;;  %v750_v44 = vadd.f32 %v1344_v21, %v749_v37  ;;  %v781_v51 = vmul.f32 %v1842_v13, %v780_v40 }
 0x189   :  { %v1346_v50 = vpop.eup %1345  ;;  %v1860_v52 = vadd.f32 1.0, %v1855_v42  ;;  %1349 = vrsqrt.f32 %v1855_v42  ;;  %vm1008_vm10 = vweird.f32 %v1855_v42 }
 0x18a   :  { %v799_v53 = vperm.slane %v797_v43, 0  ;;  %v754_v54 = vsel %vm753_vm9, %v1344_v21, %v750_v44  ;;  %v1013_v55 = vmul.f32 %v1346_v50, %v1846_v22  ;;  %v785_v62 = vsel %vm784_vm13, %v1842_v13, %v781_v51 }
 0x18b   :  { %v1348_v56 = vpop.eup %1347  ;;  %v759_v57 = vsel %vm756_vm11, %v758_v46, %v754_v54  ;;  %1351 = vrcp.f32 %v1860_v52  ;;  %vm1019_vm1 = vweird.f32 %v1346_v50  ;;  %v981_v26 = vand.u32 2147483647, %v1860_v52 }
 0x18c   :  { %v801_v58 = vmul.f32 %v799_v53, %v1814_v20  ;;  %v803_v59 = vmul.f32 %v799_v53, %v1818_v23  ;;  %v760_v60 = vmul.f32 %v759_v57, %v1838_v2  ;;  %v988_v61 = vmul.f32 %v1348_v56, %v1850_v29  ;;  %vm1020_vm4 = vmor %vm1018_vm3, %vm1019_vm1 }
 0x18d   :  { %v1014_v63 = vmul.f32 %v1346_v50, %v1013_v55  ;;  %vm993_vm14 = vweird.f32 %v1348_v56  ;;  %vm977_vm6 = vweird.f32 %v1860_v52  ;;  %vm982_vm9 = vcmp.eq.f32.partialorder %v981_v26, 8.507059e+37 }
 0x18e   :  { %805 = vst [vmem:[#allocation11 + $0x8] sm:$0xff] %v801_v58  ;;  %v796_v0 = vmul.f32 %v785_v62, %v760_v60  ;;  %v989_v3 = vsub.f32 1.0, %v988_v61  ;;  %vm994_vm0 = vmor %vm992_vm15, %vm993_vm14 }
 0x18f   :  { %v1350_v4 = vpop.eup %1349  ;;  %807 = vst [vmem:[#allocation11 + $0x18] sm:$0xff] %v803_v59  ;;  %v1015_v20 = vmul.f32 0.5, %v1014_v63 }
 0x190   :  { %v798_v8 = vperm.slane %v796_v0, 0  ;;  %v990_v23 = vmul.f32 %v1348_v56, %v989_v3  ;;  %v1003_v2 = vmul.f32 %v1350_v4, %v1855_v42  ;;  %vm1009_vm8 = vweird.f32 %v1350_v4 }
 0x191   :  { %v1352_v9 = vpop.eup %1351  ;;  %v1016_v10 = vsub.f32 1.5, %v1015_v20  ;;  %vm1010_vm11 = vmor %vm1008_vm10, %vm1009_vm8 }
 0x192   :  { %v800_v11 = vmul.f32 %v798_v8, %v1762_v47  ;;  %v802_v12 = vmul.f32 %v798_v8, %v1769_v49  ;;  %v991_v13 = vadd.f32 %v1348_v56, %v990_v23  ;;  %v973_v14 = vmul.f32 %v1352_v9, %v1860_v52 }
 0x193   :  { %v1017_v16 = vmul.f32 %v1346_v50, %v1016_v10  ;;  %v1004_v17 = vmul.f32 %v1350_v4, %v1003_v2  ;;  %v983_v47 = vand.u32 2147483648, %v1860_v52  ;;  %vm978_vm5 = vweird.f32 %v1352_v9 }
 0x194   :  { %804 = vst [vmem:[#allocation11] sm:$0xff] %v800_v11  ;;  %v995_v18 = vsel %vm994_vm0, %v1348_v56, %v991_v13  ;;  %v974_v19 = vsub.f32 1.0, %v973_v14  ;;  %vm979_vm7 = vmor %vm977_vm6, %vm978_vm5 }
 0x195   :  { %806 = vst [vmem:[#allocation11 + $0x10] sm:$0xff] %v802_v12  ;;  %v1000_v21 = vsel %vm997_vm2, %v999_v15, %v995_v18  ;;  %v1005_v24 = vmul.f32 0.5, %v1004_v17  ;;  %v1021_v27 = vsel %vm1020_vm4, %v1346_v50, %v1017_v16  ;;  %v984_v31 = vor.u32 1.1754944e-38, %v983_v47 }
 0x196   :  { %v1001_v49 = vmul.f32 %v1000_v21, %v1846_v22  ;;  %v975_v25 = vmul.f32 %v1352_v9, %v974_v19 }
 0x197   :  { %v1006_v28 = vsub.f32 1.5, %v1005_v24 }
 0x198   :  { %v1023_v29 = vmul.f32 %v1021_v27, %v1001_v49  ;;  %v976_v30 = vadd.f32 %v1352_v9, %v975_v25 }
 0x199   :  { %v1007_v32 = vmul.f32 %v1350_v4, %v1006_v28 }
 0x19a   :  { %v1025_v33 = vperm.slane %v1023_v29, 0  ;;  %v980_v34 = vsel %vm979_vm7, %v1352_v9, %v976_v30 }
 0x19b   :  { %v985_v35 = vsel %vm982_vm9, %v984_v31, %v980_v34  ;;  %v1011_v38 = vsel %vm1010_vm11, %v1350_v4, %v1007_v32 }
 0x19c   :  { %v1027_v22 = vmul.f32 %v1025_v33, %v1830_v48  ;;  %v1029_v36 = vmul.f32 %v1025_v33, %v1832_v45  ;;  %v986_v37 = vmul.f32 %v985_v35, %v1855_v42 }
 0x19e   :  { %1032 = vst [vmem:[#allocation11 + $0x28] sm:$0xff] %v1027_v22  ;;  %v1022_v39 = vmul.f32 %v1011_v38, %v986_v37 }
 0x19f   :  { %1034 = vst [vmem:[#allocation11 + $0x38] sm:$0xff] %v1029_v36 }
 0x1a0   :  { %v1024_v41 = vperm.slane %v1022_v39, 0 }
 0x1a2   :  { %v1026_v40 = vmul.f32 %v1024_v41, %v1794_v1  ;;  %v1028_v48 = vmul.f32 %v1024_v41, %v1799_v6 }
 0x1a4   :  { %1031 = vst [vmem:[#allocation11 + $0x20] sm:$0xff] %v1026_v40 }
 0x1a5   :  { %1033 = vst [vmem:[#allocation11 + $0x30] sm:$0xff] %v1028_v48 }
 0x1a6   :  { %1047 = dma.vmem_to_hbm [thread:$0]  %s1040_s3, 1024, %s1042_s15, [#allocation5], %s1489_s11, %s1489_s11, %s1490_s12  }
 0x1a7   :  { %1479 = dma.done.wait [#allocation5], 1024  }
 0x1a8   :  { %1480 = vsyncadd [#allocation5], 4294966272 }
 0x1a9   :  { %1052 = vsyncpa [#allocation4], 1 }
 0x1aa   :  { %1053 = vsyncpa [#allocation7], 1 }
 0x1ab   :  { %1054 = vsyncpa [#allocation10], 1 }
 0x1ac   :  { %1055 = vsyncpa [#allocation5], 1 }

</bundles_post_ra>
